<compile_context>
chip_gen: v5e
topology: v5e:2x2
jax: 0.10.0
libtpu: 0.0.40
codegen_flags: <defaults>
</compile_context>

<pallas_src>
import functools

import jax
import jax.numpy as jnp
from jax.experimental import pallas as pl
from jax.experimental.pallas import tpu as pltpu


def _shift_left_1(a):
    # a[:, i] <- a[:, i+1] (cyclic wrap; wrapped column only ever lands in a
    # junk position that is later multiplied by a zero row of the block-diag W).
    return jnp.concatenate([a[:, 1:], a[:, :1]], axis=1)


def _convnet_kernel(x_ref, trep_ref, wpack_ref, wblk_ref, rowpack_ref, wlast_ref,
                    out_ref):
    H = wpack_ref.shape[0]

    # packed parameters -------------------------------------------------------
    w2_cat = wpack_ref[:, 0:2 * H]              # (H, 2H)   conv2 taps, concatenated
    w1_0 = wpack_ref[:, 2 * H:2 * H + 1]        # (H, 1)
    w1_1 = wpack_ref[:, 2 * H + 1:2 * H + 2]    # (H, 1)
    b1 = wpack_ref[:, 2 * H + 2:2 * H + 3]      # (H, 1)
    b2 = wpack_ref[:, 2 * H + 3:2 * H + 4]      # (H, 1)
    colsum = rowpack_ref[0:1, :]                # (1, Bt*O)  sum over wlin second half
    blin = rowpack_ref[1:2, :]                  # (1, Bt*O)
    blast = rowpack_ref[2:3, :]                 # (1, Bt*O)

    # conv1d_1 (in_ch=1, k=2, valid) + ReLU, lane-stacked over (batch, position)
    x = x_ref[0]                                # (1, Bt*L)
    x_s = _shift_left_1(x)
    y1 = jnp.maximum(w1_0 * x + w1_1 * x_s + b1, 0.0)          # (H, Bt*L)

    # conv1d_2 (H->H, k=2, valid) + ReLU: both taps fused into one MXU matmul
    y1_cat = jnp.concatenate([y1, _shift_left_1(y1)], axis=0)  # (2H, Bt*L)
    y2 = jnp.dot(w2_cat, y1_cat, preferred_element_type=jnp.float32) + b2
    y2 = jnp.maximum(y2, 0.0)                                  # (H, Bt*L); cols j>=L-2 per block are junk

    # Linear(2*(L-2) -> O) over cat((y2, t-bcast)) + ReLU:
    #   y2-branch  : block-diagonal matmul (zero rows kill the junk columns)
    #   t-branch   : exact rank-1 update  t[b,h] * colsum[o]
    z = (jnp.dot(y2, wblk_ref[...], preferred_element_type=jnp.float32)
         + trep_ref[0] * colsum + blin)                        # (H, Bt*O)
    z = jnp.maximum(z, 0.0)

    # transpose -> Linear(H,1) -> transpose  ==  (1,H) @ (H, Bt*O), then softplus
    o = jnp.dot(wlast_ref[...], z, preferred_element_type=jnp.float32) + blast
    out_ref[0] = jnp.maximum(o, 0.0) + jnp.log(1.0 + jnp.exp(-jnp.abs(o)))


def convnet_forward(x, t, params, *, block_batch=8):
    B, c_in, L = x.shape
    assert c_in == 1
    H = params["w1"].shape[0]
    O = params["blin"].shape[0]
    assert O == L, "Linear fan-in 2*(O-2) requires sequence length L == output_size"
    f_half = L - 2
    assert params["wlin"].shape == (O, 2 * f_half)

    Bt = min(B, block_batch)                    # batch elements per grid step
    nb = (B + Bt - 1) // Bt
    B_pad = nb * Bt

    # ---- runtime data: lane-stack Bt batch elements per grid step -----------
    x2 = x[:, 0, :].astype(jnp.float32)
    t2 = t.astype(jnp.float32)
    if B_pad != B:
        x2 = jnp.concatenate([x2, jnp.zeros((B_pad - B, L), jnp.float32)], axis=0)
        t2 = jnp.concatenate([t2, jnp.zeros((B_pad - B, H), jnp.float32)], axis=0)
    x_stacked = x2.reshape(nb, 1, Bt * L)                                   # (nb, 1, Bt*L)
    t_rep = jnp.repeat(jnp.transpose(t2.reshape(nb, Bt, H), (0, 2, 1)),
                       O, axis=2)                                           # (nb, H, Bt*O)

    # ---- parameter packing (exact algebraic rewrites; folded under jit) -----
    w1 = params["w1"].reshape(H, 2).astype(jnp.float32)
    w2_cat = jnp.concatenate([params["w2"][:, :, 0], params["w2"][:, :, 1]],
                             axis=1).astype(jnp.float32)                    # (H, 2H)
    wpack = jnp.concatenate(
        [w2_cat, w1[:, 0:1], w1[:, 1:2],
         params["b1"].reshape(H, 1).astype(jnp.float32),
         params["b2"].reshape(H, 1).astype(jnp.float32)], axis=1)           # (H, 2H+4)

    wlin = params["wlin"].astype(jnp.float32)
    wlin_a_pad = jnp.concatenate([wlin[:, :f_half].T,
                                  jnp.zeros((2, O), jnp.float32)], axis=0)  # (L, O)
    wblk = jnp.kron(jnp.eye(Bt, dtype=jnp.float32), wlin_a_pad)             # (Bt*L, Bt*O)

    colsum = jnp.sum(wlin[:, f_half:], axis=1)                              # (O,)
    rowpack = jnp.stack([
        jnp.tile(colsum, Bt),
        jnp.tile(params["blin"].astype(jnp.float32), Bt),
        jnp.broadcast_to(params["blast"].astype(jnp.float32).reshape(1), (Bt * O,)),
    ], axis=0)                                                              # (3, Bt*O)

    wlast_row = params["wlast"].reshape(1, H).astype(jnp.float32)           # (1, H)

    out = pl.pallas_call(
        _convnet_kernel,
        out_shape=jax.ShapeDtypeStruct((nb, 1, Bt * O), jnp.float32),
        grid=(nb,),
        in_specs=[
            pl.BlockSpec((1, 1, Bt * L), lambda i: (i, 0, 0)),      # x (lane-stacked)
            pl.BlockSpec((1, H, Bt * O), lambda i: (i, 0, 0)),      # t (repeated per o)
            pl.BlockSpec((H, 2 * H + 4), lambda i: (0, 0)),         # packed conv weights/biases
            pl.BlockSpec((Bt * L, Bt * O), lambda i: (0, 0)),       # block-diag linear weight
            pl.BlockSpec((3, Bt * O), lambda i: (0, 0)),            # colsum / blin / blast rows
            pl.BlockSpec((1, H), lambda i: (0, 0)),                 # last-layer weight row
        ],
        out_specs=pl.BlockSpec((1, 1, Bt * O), lambda i: (i, 0, 0)),
        compiler_params=pltpu.CompilerParams(dimension_semantics=("parallel",)),
    )(x_stacked, t_rep, wpack, wblk, rowpack, wlast_row)

    return out.reshape(B_pad, O)[:B].reshape(B, 1, O)


def convnet_reference(x, t, params):
    """Pure-JAX reference mirroring the PyTorch forward literally."""
    xs = x[:, 0, :]                                            # (B, L)
    w1 = params["w1"]                                          # (H, 1, 2)
    y1 = (xs[:, None, :-1] * w1[None, :, 0, 0:1]
          + xs[:, None, 1:] * w1[None, :, 0, 1:2]
          + params["b1"][None, :, None])
    y1 = jax.nn.relu(y1)
    y2 = (jnp.einsum("hc,bci->bhi", params["w2"][:, :, 0], y1[:, :, :-1])
          + jnp.einsum("hc,bci->bhi", params["w2"][:, :, 1], y1[:, :, 1:])
          + params["b2"][None, :, None])
    y2 = jax.nn.relu(y2)
    cat = jnp.concatenate(
        [y2, t[:, :, None] * jnp.ones_like(y2)], axis=2)        # (B, H, 2*(L-2))
    z = jnp.einsum("bhf,of->bho", cat, params["wlin"]) + params["blin"][None, None, :]
    z = jax.nn.relu(z)
    zt = jnp.swapaxes(z, 1, 2)                                  # (B, O, H)
    o = jnp.einsum("boh,qh->boq", zt, params["wlast"]) + params["blast"]
    o = jnp.swapaxes(o, 1, 2)                                   # (B, 1, O)
    return jax.nn.softplus(o)


def init_params(key, output_size, hidden_size, kernel_size):
    H, O, K = hidden_size, output_size, kernel_size
    f_in_lin = 2 * (O - K)
    ks = jax.random.split(key, 8)

    def u(k, shape, fan_in):
        bound = 1.0 / jnp.sqrt(float(fan_in))
        return jax.random.uniform(k, shape, jnp.float32, -bound, bound)

    return {
        "w1": u(ks[0], (H, 1, K), 1 * K),
        "b1": u(ks[1], (H,), 1 * K),
        "w2": u(ks[2], (H, H, K), H * K),
        "b2": u(ks[3], (H,), H * K),
        "wlin": u(ks[4], (O, f_in_lin), f_in_lin),
        "blin": u(ks[5], (O,), f_in_lin),
        "wlast": u(ks[6], (1, H), H),
        "blast": u(ks[7], (1,), H),
    }


if __name__ == "__main__":
    B = 2
    hidden_size = 32
    output_size = 16          # sequence length L must equal output_size (Linear fan-in)
    kernel_size = 2
    L = output_size

    root = jax.random.PRNGKey(0)
    kp, kx, kt = jax.random.split(root, 3)
    params = init_params(kp, output_size, hidden_size, kernel_size)
    x = jax.random.normal(kx, (B, 1, L), jnp.float32)
    t = jax.random.normal(kt, (B, hidden_size), jnp.float32)

    fwd = jax.jit(convnet_forward)
    out = jax.block_until_ready(fwd(x, t, params))
    ref = jax.block_until_ready(convnet_reference(x, t, params))

    assert out.shape == (B, 1, output_size), out.shape
    assert jnp.allclose(out, ref, atol=1e-4, rtol=1e-4), \
        f"max abs diff {jnp.max(jnp.abs(out - ref))}"
    print("KERNEL_OK")
</pallas_src>

<mosaic_0001>
module attributes {stable_mosaic.version = 11 : i64} {
  func.func @_convnet_kernel(%arg0: i32, %arg1: memref<1x1x32xf32, #tpu.memory_space<vmem>>, %arg2: memref<1x32x32xf32, #tpu.memory_space<vmem>>, %arg3: memref<32x68xf32, #tpu.memory_space<vmem>>, %arg4: memref<32x32xf32, #tpu.memory_space<vmem>>, %arg5: memref<3x32xf32, #tpu.memory_space<vmem>>, %arg6: memref<1x32xf32, #tpu.memory_space<vmem>>, %arg7: memref<1x1x32xf32, #tpu.memory_space<vmem>>) attributes {dimension_semantics = [#tpu.dimension_semantics<parallel>], iteration_bounds = array<i64: 1>, scalar_prefetch = 0 : i64, scratch_operands = 0 : i64, tpu.core_type = #tpu.core_type<tc>, window_params = [{transform_indices = @transform_0, window_bounds = array<i64: 1, 1, 32>}, {transform_indices = @transform_1, window_bounds = array<i64: 1, 32, 32>}, {pipeline_mode = #tpu.pipeline_mode<synchronous>, transform_indices = @transform_2, window_bounds = array<i64: 32, 68>}, {pipeline_mode = #tpu.pipeline_mode<synchronous>, transform_indices = @transform_3, window_bounds = array<i64: 32, 32>}, {pipeline_mode = #tpu.pipeline_mode<synchronous>, transform_indices = @transform_4, window_bounds = array<i64: 3, 32>}, {pipeline_mode = #tpu.pipeline_mode<synchronous>, transform_indices = @transform_5, window_bounds = array<i64: 1, 32>}, {transform_indices = @transform_6, window_bounds = array<i64: 1, 1, 32>}]} {
    %c0 = arith.constant 0 : index
    %c0_0 = arith.constant 0 : index
    %0 = vector.load %arg3[%c0, %c0_0] : memref<32x68xf32, #tpu.memory_space<vmem>>, vector<32x64xf32>
    %c0_1 = arith.constant 0 : index
    %c64 = arith.constant 64 : index
    %1 = vector.load %arg3[%c0_1, %c64] : memref<32x68xf32, #tpu.memory_space<vmem>>, vector<32x1xf32>
    %c0_2 = arith.constant 0 : index
    %c65 = arith.constant 65 : index
    %2 = vector.load %arg3[%c0_2, %c65] : memref<32x68xf32, #tpu.memory_space<vmem>>, vector<32x1xf32>
    %c0_3 = arith.constant 0 : index
    %c66 = arith.constant 66 : index
    %3 = vector.load %arg3[%c0_3, %c66] : memref<32x68xf32, #tpu.memory_space<vmem>>, vector<32x1xf32>
    %c0_4 = arith.constant 0 : index
    %c67 = arith.constant 67 : index
    %4 = vector.load %arg3[%c0_4, %c67] : memref<32x68xf32, #tpu.memory_space<vmem>>, vector<32x1xf32>
    %c0_5 = arith.constant 0 : index
    %c0_6 = arith.constant 0 : index
    %5 = vector.load %arg5[%c0_5, %c0_6] : memref<3x32xf32, #tpu.memory_space<vmem>>, vector<1x32xf32>
    %c1 = arith.constant 1 : index
    %c0_7 = arith.constant 0 : index
    %6 = vector.load %arg5[%c1, %c0_7] : memref<3x32xf32, #tpu.memory_space<vmem>>, vector<1x32xf32>
    %c2 = arith.constant 2 : index
    %c0_8 = arith.constant 0 : index
    %7 = vector.load %arg5[%c2, %c0_8] : memref<3x32xf32, #tpu.memory_space<vmem>>, vector<1x32xf32>
    %c0_9 = arith.constant 0 : index
    %c0_10 = arith.constant 0 : index
    %c0_11 = arith.constant 0 : index
    %8 = vector.load %arg1[%c0_9, %c0_10, %c0_11] : memref<1x1x32xf32, #tpu.memory_space<vmem>>, vector<1x1x32xf32>
    %9 = vector.shape_cast %8 : vector<1x1x32xf32> to vector<1x32xf32>
    %10 = vector.extract_strided_slice %9 {offsets = [0, 1], sizes = [1, 31], strides = [1, 1]} : vector<1x32xf32> to vector<1x31xf32>
    %11 = vector.extract_strided_slice %9 {offsets = [0, 0], sizes = [1, 1], strides = [1, 1]} : vector<1x32xf32> to vector<1x1xf32>
    %12 = tpu.concatenate %10, %11 in 1 : vector<1x31xf32>, vector<1x1xf32> -> vector<1x32xf32>
    %13 = vector.broadcast %1 : vector<32x1xf32> to vector<32x32xf32>
    %14 = vector.broadcast %9 : vector<1x32xf32> to vector<32x32xf32>
    %15 = arith.mulf %13, %14 : vector<32x32xf32>
    %16 = vector.broadcast %2 : vector<32x1xf32> to vector<32x32xf32>
    %17 = vector.broadcast %12 : vector<1x32xf32> to vector<32x32xf32>
    %18 = arith.mulf %16, %17 : vector<32x32xf32>
    %19 = arith.addf %15, %18 : vector<32x32xf32>
    %20 = vector.broadcast %3 : vector<32x1xf32> to vector<32x32xf32>
    %21 = arith.addf %19, %20 : vector<32x32xf32>
    %cst = arith.constant 0.000000e+00 : f32
    %22 = vector.broadcast %cst : f32 to vector<32x32xf32>
    %23 = arith.maximumf %21, %22 : vector<32x32xf32>
    %24 = vector.extract_strided_slice %23 {offsets = [0, 1], sizes = [32, 31], strides = [1, 1]} : vector<32x32xf32> to vector<32x31xf32>
    %25 = vector.extract_strided_slice %23 {offsets = [0, 0], sizes = [32, 1], strides = [1, 1]} : vector<32x32xf32> to vector<32x1xf32>
    %26 = tpu.concatenate %24, %25 in 1 : vector<32x31xf32>, vector<32x1xf32> -> vector<32x32xf32>
    %27 = tpu.concatenate %23, %26 in 0 : vector<32x32xf32>, vector<32x32xf32> -> vector<64x32xf32>
    %cst_12 = arith.constant dense<0.000000e+00> : vector<32x32xf32>
    %28 = tpu.matmul %0, %27, %cst_12 {dimension_numbers = #tpu.dot_dimension_numbers<[1], [0], [0], [1], [0, 0, 1, 1], [], []>} : vector<32x64xf32>, vector<64x32xf32>, vector<32x32xf32> -> vector<32x32xf32>
    %29 = vector.broadcast %4 : vector<32x1xf32> to vector<32x32xf32>
    %30 = arith.addf %28, %29 : vector<32x32xf32>
    %cst_13 = arith.constant 0.000000e+00 : f32
    %31 = vector.broadcast %cst_13 : f32 to vector<32x32xf32>
    %32 = arith.maximumf %30, %31 : vector<32x32xf32>
    %c0_14 = arith.constant 0 : index
    %c0_15 = arith.constant 0 : index
    %33 = vector.load %arg4[%c0_14, %c0_15] : memref<32x32xf32, #tpu.memory_space<vmem>>, vector<32x32xf32>
    %cst_16 = arith.constant dense<0.000000e+00> : vector<32x32xf32>
    %34 = tpu.matmul %32, %33, %cst_16 {dimension_numbers = #tpu.dot_dimension_numbers<[1], [0], [0], [1], [0, 0, 1, 1], [], []>} : vector<32x32xf32>, vector<32x32xf32>, vector<32x32xf32> -> vector<32x32xf32>
    %c0_17 = arith.constant 0 : index
    %c0_18 = arith.constant 0 : index
    %c0_19 = arith.constant 0 : index
    %35 = vector.load %arg2[%c0_17, %c0_18, %c0_19] : memref<1x32x32xf32, #tpu.memory_space<vmem>>, vector<1x32x32xf32>
    %36 = vector.shape_cast %35 : vector<1x32x32xf32> to vector<32x32xf32>
    %37 = vector.broadcast %5 : vector<1x32xf32> to vector<32x32xf32>
    %38 = arith.mulf %36, %37 : vector<32x32xf32>
    %39 = arith.addf %34, %38 : vector<32x32xf32>
    %40 = vector.broadcast %6 : vector<1x32xf32> to vector<32x32xf32>
    %41 = arith.addf %39, %40 : vector<32x32xf32>
    %cst_20 = arith.constant 0.000000e+00 : f32
    %42 = vector.broadcast %cst_20 : f32 to vector<32x32xf32>
    %43 = arith.maximumf %41, %42 : vector<32x32xf32>
    %c0_21 = arith.constant 0 : index
    %c0_22 = arith.constant 0 : index
    %44 = vector.load %arg6[%c0_21, %c0_22] : memref<1x32xf32, #tpu.memory_space<vmem>>, vector<1x32xf32>
    %cst_23 = arith.constant dense<0.000000e+00> : vector<1x32xf32>
    %45 = tpu.matmul %44, %43, %cst_23 {dimension_numbers = #tpu.dot_dimension_numbers<[1], [0], [0], [1], [0, 0, 1, 1], [], []>} : vector<1x32xf32>, vector<32x32xf32>, vector<1x32xf32> -> vector<1x32xf32>
    %46 = arith.addf %45, %7 : vector<1x32xf32>
    %cst_24 = arith.constant 0.000000e+00 : f32
    %47 = vector.broadcast %cst_24 : f32 to vector<1x32xf32>
    %48 = arith.maximumf %46, %47 : vector<1x32xf32>
    %49 = math.absf %46 : vector<1x32xf32>
    %cst_25 = arith.constant 0.000000e+00 : f32
    %50 = vector.broadcast %cst_25 : f32 to vector<1x32xf32>
    %51 = arith.subf %50, %49 : vector<1x32xf32>
    %52 = math.exp %51 : vector<1x32xf32>
    %cst_26 = arith.constant 1.000000e+00 : f32
    %53 = vector.broadcast %cst_26 : f32 to vector<1x32xf32>
    %54 = arith.addf %53, %52 : vector<1x32xf32>
    %55 = math.log %54 : vector<1x32xf32>
    %56 = arith.addf %48, %55 : vector<1x32xf32>
    %c0_27 = arith.constant 0 : index
    %c0_28 = arith.constant 0 : index
    %c0_29 = arith.constant 0 : index
    %57 = vector.load %arg7[%c0_27, %c0_28, %c0_29] : memref<1x1x32xf32, #tpu.memory_space<vmem>>, vector<1x1x32xf32>
    %58 = vector.shape_cast %57 : vector<1x1x32xf32> to vector<1x32xf32>
    %59 = vector.shape_cast %56 : vector<1x32xf32> to vector<1x1x32xf32>
    tpu.vector_store %arg7[%c0_27, %c0_28, %c0_29], %59 {strides = array<i32>} : memref<1x1x32xf32, #tpu.memory_space<vmem>>, vector<1x1x32xf32>,
    return
  }
  func.func @transform_0(%arg0: i32) -> (i32, i32, i32) {
    %c0_i32 = arith.constant 0 : i32
    %c0_i32_0 = arith.constant 0 : i32
    %c0_i32_1 = arith.constant 0 : i32
    return %arg0, %c0_i32, %c0_i32_0 : i32, i32, i32
  }
  func.func @transform_1(%arg0: i32) -> (i32, i32, i32) {
    %c0_i32 = arith.constant 0 : i32
    %c0_i32_0 = arith.constant 0 : i32
    %c0_i32_1 = arith.constant 0 : i32
    return %arg0, %c0_i32, %c0_i32_0 : i32, i32, i32
  }
  func.func @transform_2(%arg0: i32) -> (i32, i32) {
    %c0_i32 = arith.constant 0 : i32
    %c0_i32_0 = arith.constant 0 : i32
    %c0_i32_1 = arith.constant 0 : i32
    return %c0_i32, %c0_i32_0 : i32, i32
  }
  func.func @transform_3(%arg0: i32) -> (i32, i32) {
    %c0_i32 = arith.constant 0 : i32
    %c0_i32_0 = arith.constant 0 : i32
    %c0_i32_1 = arith.constant 0 : i32
    return %c0_i32, %c0_i32_0 : i32, i32
  }
  func.func @transform_4(%arg0: i32) -> (i32, i32) {
    %c0_i32 = arith.constant 0 : i32
    %c0_i32_0 = arith.constant 0 : i32
    %c0_i32_1 = arith.constant 0 : i32
    return %c0_i32, %c0_i32_0 : i32, i32
  }
  func.func @transform_5(%arg0: i32) -> (i32, i32) {
    %c0_i32 = arith.constant 0 : i32
    %c0_i32_0 = arith.constant 0 : i32
    %c0_i32_1 = arith.constant 0 : i32
    return %c0_i32, %c0_i32_0 : i32, i32
  }
  func.func @transform_6(%arg0: i32) -> (i32, i32, i32) {
    %c0_i32 = arith.constant 0 : i32
    %c0_i32_0 = arith.constant 0 : i32
    %c0_i32_1 = arith.constant 0 : i32
    return %arg0, %c0_i32, %c0_i32_0 : i32, i32, i32
  }
}

</mosaic_0001>

<bundles_post_ra>
// kernel: tile.13
= control target key start
LH: loop header
LB: loop body
LE: loop exit
PB: predicated region body
PF: predicated region fallthrough
CT: control target
= control target key end

     0   :  { %s22_s0 = inlined_call_operand.vmem [shape: f32[16], index: 0, kind: input, shape index: {}]   ;;  %s23_s1 = inlined_call_operand.vmem [shape: f32[2,16], index: 1, kind: output, shape index: {}]  }
   0x1   :  { %v4_v0 = vld [vmem:[%s22_s0] ss:$0 sm:$0xff] }
   0x2   :  { %5 = vst [vmem:[%s23_s1] sm:$0x3] %v4_v0 }

// kernel: tile.18
= control target key start
LH: loop header
LB: loop body
LE: loop exit
PB: predicated region body
PF: predicated region fallthrough
CT: control target
= control target key end

     0   :  { %vm7_vm0 = vcmask 130048   ;;  %vm13_vm1 = vcmask 261248   ;;  %s39_s0 = inlined_call_operand.vmem [shape: f32[2,16], index: 0, kind: input, shape index: {}]   ;;  %s40_s1 = inlined_call_operand.vmem [shape: f32[1,32], index: 1, kind: output, shape index: {}]  }
   0x1   :  { %v4_v0 = vld [vmem:[%s39_s0] sm:$0x3]  ;;  %s22_s0 = smov 16  }
   0x2   :  { %5 = vst [vmem:[#allocation1] sm:$0x3] %v4_v0 }
   0x9   :  { %v10_v1 = vld [vmem:[#allocation1 + $0x1] sm:$0x1]   ;;  %v6_v2 = vld [vmem:[#allocation1] sm:$0x1]  }
   0xa   :  { %11 = vrot.lane.b32.xlu0 %v10_v1, %s22_s0  ;;  %8 = vst.msk [vmem:[#allocation0] sm:$0x1] %vm7_vm0, %v6_v2  }
  0x7c   :  { %v12_v3 = vpop.permute.xlu0 %11  }
  0x7d   :  { %14 = vst.msk [vmem:[#allocation0] sm:$0x1] %vm13_vm1, %v12_v3  }
  0x84   :  { %v17_v4 = vld [vmem:[#allocation0] sm:$0x1] }
  0x85   :  { %20 = vst [vmem:[%s40_s1] sm:$0x1] %v17_v4 }

// kernel: squeeze.3
= control target key start
LH: loop header
LB: loop body
LE: loop exit
PB: predicated region body
PF: predicated region fallthrough
CT: control target
= control target key end

     0   :  { %vm7_vm0 = vcmask 130048   ;;  %vm13_vm1 = vcmask 261248   ;;  %s39_s0 = inlined_call_operand.vmem [shape: f32[2,16], index: 0, kind: input, shape index: {}]   ;;  %s40_s1 = inlined_call_operand.vmem [shape: f32[1,1,32], index: 1, kind: output, shape index: {}]  }
   0x1   :  { %v4_v0 = vld [vmem:[%s39_s0] sm:$0x3]  ;;  %s22_s0 = smov 16  }
   0x2   :  { %5 = vst [vmem:[#allocation1] sm:$0x3] %v4_v0 }
   0x9   :  { %v10_v1 = vld [vmem:[#allocation1 + $0x1] sm:$0x1]   ;;  %v6_v2 = vld [vmem:[#allocation1] sm:$0x1]  }
   0xa   :  { %11 = vrot.lane.b32.xlu0 %v10_v1, %s22_s0  ;;  %8 = vst.msk [vmem:[#allocation0] sm:$0x1] %vm7_vm0, %v6_v2  }
  0x7c   :  { %v12_v3 = vpop.permute.xlu0 %11  }
  0x7d   :  { %14 = vst.msk [vmem:[#allocation0] sm:$0x1] %vm13_vm1, %v12_v3  }
  0x84   :  { %v17_v4 = vld [vmem:[#allocation0] sm:$0x1] }
  0x85   :  { %20 = vst [vmem:[%s40_s1] sm:$0x1] %v17_v4 }

// kernel: convnet_forward.1
= control target key start
LH: loop header
LB: loop body
LE: loop exit
PB: predicated region body
PF: predicated region fallthrough
CT: control target
= control target key end

     0   :  { %v376_v0 = vmov 64   ;;  %s377_s27 = smov 127   ;;  %v378_v4 = vmov 65   ;;  %s379_s28 = smov 31   ;;  %v380_v6 = vmov 66   ;;  %vm39_vm0 = vcmask 252928   ;;  %s515_s2 = inlined_call_operand.vmem [shape: f32[32,68], index: 2, kind: input, shape index: {}]   ;;  %s516_s0 = inlined_call_operand.vmem [shape: f32[1,1,32], index: 0, kind: input, shape index: {}]   ;;  %s517_s3 = inlined_call_operand.vmem [shape: f32[32,32], index: 3, kind: input, shape index: {}]   ;;  %s518_s4 = inlined_call_operand.vmem [shape: f32[3,32], index: 4, kind: input, shape index: {}]   ;;  %s519_s1 = inlined_call_operand.vmem [shape: f32[1,32,32], index: 1, kind: input, shape index: {}]   ;;  %s520_s5 = inlined_call_operand.vmem [shape: f32[1,32], index: 5, kind: input, shape index: {}]   ;;  %s521_s6 = inlined_call_operand.vmem [shape: f32[1,1,32], index: 6, kind: output, shape index: {}]  }
   0x1   :  { %335 = vset.pattern.permute.xlu1 %v376_v0  ;;  %v420_v1 = vld [vmem:[%s515_s2 + $0x18] sm:$0xff]  ;;  %v369_v2 = vld [vmem:[%s516_s0] ss:$0 sm:$0xff]  ;;  %337 = vset.pattern.permute.xlu2 %v376_v0  ;;  %v429_v3 = vld [vmem:[%s515_s2 + $0x10] sm:$0xff]  ;;  %v381_v52 = vmov 67   ;;  %vm163_vm1 = vcmask 523264  }
   0x2   :  { %58 = vperm.xlu1 %335, %v420_v1   ;;  %339 = vset.pattern.permute.xlu0 %v376_v0  ;;  %v439_v5 = vld [vmem:[%s515_s2 + $0x8] sm:$0xff]  ;;  %v447_v7 = vld [vmem:[%s515_s2] sm:$0xff]  ;;  %v208_v48 = vld [vmem:[%s517_s3 + $0x18] sm:$0xff]  ;;  %vm218_vm2 = vcmask 261120   ;;  %vm302_vm3 = vcmask 253952  }
   0x3   :  { %33 = vrot.lane.b32.xlu0 %v369_v2, %s377_s27  ;;  %53 = vperm.xlu2 %337, %v429_v3  }
   0x4   :  { %243 = vmatpush.msra.mxu1 %v208_v48  ;;  %325 = vmatpush.msra.mxu2 %v208_v48 }
   0xa   :  { %336 = vset.pattern.permute.xlu1 %v378_v4 }
   0xb   :  { %79 = vperm.xlu1 %336, %v420_v1   ;;  %36 = vrot.lane.b32.xlu0 %v369_v2, %s379_s28 }
   0xc   :  { %338 = vset.pattern.permute.xlu2 %v378_v4 }
   0xd   :  { %75 = vperm.xlu2 %338, %v429_v3  }
  0x13   :  { %71 = vperm.xlu1 %336, %v439_v5   ;;  %48 = vperm.xlu0 %339, %v439_v5  }
  0x15   :  { %340 = vset.pattern.permute.xlu2 %v380_v6 }
  0x16   :  { %104 = vperm.xlu2 %340, %v420_v1  }
  0x1b   :  { %341 = vset.pattern.permute.xlu1 %v376_v0  ;;  %343 = vset.pattern.permute.xlu0 %v380_v6  ;;  %v207_v0 = vld [vmem:[%s517_s3 + $0x10] sm:$0xff] }
  0x1c   :  { %43 = vperm.xlu1 %341, %v447_v7   ;;  %100 = vperm.xlu0 %343, %v429_v3  }
  0x1d   :  { %244 = vmatpush.msra.mxu1 %v207_v0  ;;  %326 = vmatpush.msra.mxu2 %v207_v0 }
  0x1e   :  { %342 = vset.pattern.permute.xlu2 %v378_v4 }
  0x1f   :  { %67 = vperm.xlu2 %342, %v447_v7  }
  0x24   :  { %344 = vset.pattern.permute.xlu1 %v380_v6  ;;  %367 = vset.pattern.permute.xlu0 %v381_v52 }
  0x25   :  { %96 = vperm.xlu1 %344, %v439_v5  }
  0x27   :  { %345 = vset.pattern.permute.xlu2 %v380_v6 }
  0x28   :  { %92 = vperm.xlu2 %345, %v447_v7  }
  0x2d   :  { %368 = vset.pattern.permute.xlu1 %v381_v52 }
  0x30   :  { %366 = vset.pattern.permute.xlu2 %v381_v52 }
  0x5d   :  { %v54_v8 = vpop.permute.xlu2 %53 }
  0x5e   :  { %v64_v23 = vmul.f32 %v369_v2, %v54_v8 }
  0x67   :  { %v76_v11 = vpop.permute.xlu2 %75 }
  0x70   :  { %v105_v15 = vpop.permute.xlu2 %104 }
  0x74   :  { %v59_v9 = vpop.permute.xlu1 %58 }
  0x75   :  { %v34_v10 = vpop.permute.xlu0 %33  ;;  %v65_v20 = vmul.f32 %v369_v2, %v59_v9 }
  0x79   :  { %v68_v24 = vpop.permute.xlu2 %67 }
  0x7d   :  { %v80_v12 = vpop.permute.xlu1 %79  ;;  %v37_v13 = vpop.permute.xlu0 %36 }
  0x7e   :  { %v40_v14 = vsel %vm39_vm0, %v34_v10, %v37_v13 }
  0x7f   :  { %v82_v16 = vperm.slane %v40_v14, 0 }
  0x81   :  { %v86_v17 = vmul.f32 %v82_v16, %v80_v12  ;;  %v85_v22 = vmul.f32 %v82_v16, %v76_v11  ;;  %v83_v31 = vmul.f32 %v82_v16, %v68_v24  ;;  %v212_v24 = vld [vmem:[%s519_s1 + $0x18] sm:$0xff] }
  0x82   :  { %v93_v37 = vpop.permute.xlu2 %92 }
  0x83   :  { %v90_v21 = vadd.f32 %v86_v17, %v65_v20  ;;  %v89_v25 = vadd.f32 %v85_v22, %v64_v23  ;;  %v370_v22 = vld [vmem:[%s518_s4] ss:$0 sm:$0xff]  ;;  %v210_v23 = vld [vmem:[%s519_s1 + $0x8] sm:$0xff] }
  0x85   :  { %v72_v18 = vpop.permute.xlu1 %71  ;;  %v49_v19 = vpop.permute.xlu0 %48  ;;  %v110_v26 = vadd.f32 %v105_v15, %v90_v21  ;;  %v211_v21 = vld [vmem:[%s519_s1 + $0x10] sm:$0xff] }
  0x86   :  { %v84_v34 = vmul.f32 %v82_v16, %v72_v18  ;;  %v63_v35 = vmul.f32 %v369_v2, %v49_v19 }
  0x87   :  { %v114_v33 = vmax.f32 %v110_v26, 0.0  ;;  %v209_v26 = vld [vmem:[%s519_s1] sm:$0xff] }
  0x88   :  { %v88_v40 = vadd.f32 %v84_v34, %v63_v35  ;;  %v371_v35 = vld [vmem:[%s518_s4 + $0x1] ss:$0 sm:$0xff] }
  0x8e   :  { %v44_v27 = vpop.permute.xlu1 %43  ;;  %v101_v28 = vpop.permute.xlu0 %100 }
  0x8f   :  { %v62_v29 = vmul.f32 %v369_v2, %v44_v27  ;;  %v109_v30 = vadd.f32 %v101_v28, %v89_v25  ;;  %v206_v2 = vld [vmem:[%s517_s3 + $0x8] sm:$0xff]  ;;  %v216_v25 = vmul.f32 %v370_v22, %v211_v21  ;;  %v215_v28 = vmul.f32 %v370_v22, %v210_v23 }
  0x90   :  { %245 = vmatpush.msra.mxu1 %v206_v2  ;;  %327 = vmatpush.msra.mxu2 %v206_v2 }
  0x91   :  { %v113_v32 = vmax.f32 %v109_v30, 0.0  ;;  %v87_v36 = vadd.f32 %v83_v31, %v62_v29  ;;  %v217_v29 = vmul.f32 %v370_v22, %v212_v24  ;;  %v214_v30 = vmul.f32 %v370_v22, %v209_v26 }
  0x93   :  { %v351_v38 = vpack.i.bf16 %v113_v32, %v114_v33  ;;  %v107_v39 = vadd.f32 %v93_v37, %v87_v36 }
  0x95   :  { %352 = vrot.lane.b32.xlu2 %v351_v38, %s379_s28  ;;  %347 = vrot.lane.b32.xlu1 %v351_v38, %s377_s27  ;;  %v111_v43 = vmax.f32 %v107_v39, 0.0 }
  0x97   :  { %v97_v41 = vpop.permute.xlu1 %96 }
  0x98   :  { %v108_v42 = vadd.f32 %v97_v41, %v88_v40 }
  0x9a   :  { %v112_v44 = vmax.f32 %v108_v42, 0.0 }
  0x9c   :  { %v361_v45 = vpack.i.bf16 %v111_v43, %v112_v44 }
  0x9d   :  { %148 = vperm.xlu2 %366, %v447_v7  }
  0x9e   :  { %362 = vrot.lane.b32.xlu1 %v361_v45, %s379_s28  ;;  %357 = vrot.lane.b32.xlu0 %v361_v45, %s377_s27  ;;  %v269_v45 = vld [vmem:[%s520_s5] sm:$0x1] }
  0xa5   :  { %156 = vperm.xlu2 %366, %v429_v3  }
  0xa6   :  { %152 = vperm.xlu0 %367, %v439_v5   ;;  %160 = vperm.xlu1 %368, %v420_v1  }
  0xef   :  { %v353_v46 = vpop.permute.xlu2 %352 }
  0xf0   :  { %v354_v49 = vunpack.i.l.bf16 %v353_v46  ;;  %v355_v53 = vunpack.i.h.bf16 %v353_v46  ;;  %v29_v46 = vld [vmem:[%s518_s4 + $0x2] sm:$0x1] }
  0xf7   :  { %v149_v4 = vpop.permute.xlu2 %148 }
  0xff   :  { %v157_v12 = vpop.permute.xlu2 %156 }
 0x107   :  { %v348_v47 = vpop.permute.xlu1 %347 }
 0x108   :  { %v350_v50 = vunpack.i.h.bf16 %v348_v47  ;;  %v349_v51 = vunpack.i.l.bf16 %v348_v47 }
 0x10a   :  { %v146_v54 = vsel %vm39_vm0, %v349_v51, %v354_v49  ;;  %v145_v55 = vsel %vm39_vm0, %v350_v50, %v355_v53 }
 0x10b   :  { %180 = vmatpush.msra.mxu0 %v146_v54  ;;  %317 = vmatpush.msra.mxu3 %v146_v54 }
 0x10d   :  { %181 = vmatpush.msra.mxu0 %v145_v55  ;;  %318 = vmatpush.msra.mxu3 %v145_v55 }
 0x110   :  { %v363_v56 = vpop.permute.xlu1 %362  ;;  %v358_v57 = vpop.permute.xlu0 %357 }
 0x111   :  { %v365_v58 = vunpack.i.h.bf16 %v363_v56  ;;  %v364_v59 = vunpack.i.l.bf16 %v363_v56  ;;  %v360_v60 = vunpack.i.h.bf16 %v358_v57  ;;  %v359_v61 = vunpack.i.l.bf16 %v358_v57 }
 0x113   :  { %v144_v62 = vsel %vm39_vm0, %v359_v61, %v364_v59  ;;  %v143_v63 = vsel %vm39_vm0, %v360_v60, %v365_v58 }
 0x114   :  { %182 = vmatpush.msra.mxu0 %v144_v62  ;;  %319 = vmatpush.msra.mxu3 %v144_v62 }
 0x116   :  { %183 = vmatpush.msra.mxu0 %v143_v63  ;;  %320 = vmatpush.msra.mxu3 %v143_v63 }
 0x118   :  { %184 = vmatpush.msra.mxu0 %v114_v33  ;;  %321 = vmatpush.msra.mxu3 %v114_v33  ;;  %v153_v8 = vpop.permute.xlu0 %152  ;;  %v161_v13 = vpop.permute.xlu1 %160 }
 0x11a   :  { %185 = vmatpush.msra.mxu0 %v113_v32  ;;  %322 = vmatpush.msra.mxu3 %v113_v32 }
 0x11c   :  { %186 = vmatpush.msra.mxu0 %v112_v44  ;;  %323 = vmatpush.msra.mxu3 %v112_v44 }
 0x11e   :  { %187 = vmatpush.msra.mxu0 %v111_v43  ;;  %324 = vmatpush.msra.mxu3 %v111_v43 }
 0x11f   :  { %308 = vmatmul.msk.f32.vlgmr.msra.gmra.mxu0 %vm163_vm1, %v447_v7  ;;  %310 = vmatmul.msk.f32.vlgmr.msra.gmra.mxu3 %vm163_vm1, %v429_v3  ;;  %v205_v3 = vld [vmem:[%s517_s3] sm:$0xff] }
 0x120   :  { %246 = vmatpush.msra.mxu1 %v205_v3  ;;  %328 = vmatpush.msra.mxu2 %v205_v3 }
 0x127   :  { %309 = vmatmul.msk.f32.gmra.mxu0 %vm163_vm1, %v439_v5  ;;  %311 = vmatmul.msk.f32.gmra.mxu3 %vm163_vm1, %v420_v1 }
 0x19c   :  { %v189_v1 = vpop.f32.mrf.mxu0 }
 0x19d   :  { %v190_v5 = vadd.f32 %v189_v1, %v149_v4 }
 0x19f   :  { %v201_v6 = vmax.f32 %v190_v5, 0.0 }
 0x1a1   :  { %312 = vmatmul.msk.f32.vlgmr.msra.gmra.mxu1 %vm218_vm2, %v201_v6 }
 0x1a2   :  { %v195_v7 = vpop.f32.mrf.mxu3 }
 0x1a3   :  { %v196_v15 = vadd.f32 %v195_v7, %v157_v12 }
 0x1a4   :  { %v192_v9 = vpop.f32.mrf.mxu0 }
 0x1a5   :  { %v193_v10 = vadd.f32 %v192_v9, %v153_v8  ;;  %v203_v18 = vmax.f32 %v196_v15, 0.0 }
 0x1a7   :  { %v202_v11 = vmax.f32 %v193_v10, 0.0 }
 0x1a9   :  { %313 = vmatmul.msk.f32.gmra.mxu1 %vm218_vm2, %v202_v11 }
 0x1aa   :  { %v198_v14 = vpop.f32.mrf.mxu3 }
 0x1ab   :  { %v199_v16 = vadd.f32 %v198_v14, %v161_v13 }
 0x1ad   :  { %v204_v17 = vmax.f32 %v199_v16, 0.0 }
 0x1af   :  { %315 = vmatmul.msk.f32.vlgmr.msra.gmra.mxu2 %vm218_vm2, %v204_v17 }
 0x1b1   :  { %314 = vmatmul.msk.f32.gmra.mxu1 %vm218_vm2, %v203_v18 }
 0x21e   :  { %v248_v19 = vpop.f32.mrf.mxu1 }
 0x21f   :  { %v249_v36 = vadd.f32 %v248_v19, %v214_v30 }
 0x221   :  { %v261_v42 = vadd.f32 %v371_v35, %v249_v36 }
 0x223   :  { %v265_v44 = vmax.f32 %v261_v42, 0.0 }
 0x226   :  { %v251_v20 = vpop.f32.mrf.mxu1 }
 0x227   :  { %v252_v33 = vadd.f32 %v251_v20, %v215_v28 }
 0x229   :  { %v262_v40 = vadd.f32 %v371_v35, %v252_v33 }
 0x22b   :  { %v266_v43 = vmax.f32 %v262_v40, 0.0 }
 0x22e   :  { %v254_v27 = vpop.f32.mrf.mxu1 }
 0x22f   :  { %v255_v31 = vadd.f32 %v254_v27, %v216_v25 }
 0x231   :  { %v263_v38 = vadd.f32 %v371_v35, %v255_v31 }
 0x232   :  { %v257_v32 = vpop.f32.mrf.mxu2 }
 0x233   :  { %v258_v34 = vadd.f32 %v257_v32, %v217_v29  ;;  %v267_v41 = vmax.f32 %v263_v38, 0.0 }
 0x235   :  { %v264_v37 = vadd.f32 %v371_v35, %v258_v34 }
 0x237   :  { %v268_v39 = vmax.f32 %v264_v37, 0.0 }
 0x239   :  { %285 = vmatpush.msrb.mxu2 %v268_v39 }
 0x23b   :  { %286 = vmatpush.msrb.mxu2 %v267_v41 }
 0x23d   :  { %287 = vmatpush.msrb.mxu2 %v266_v43 }
 0x23f   :  { %288 = vmatpush.msrb.mxu2 %v265_v44 }
 0x240   :  { %316 = vmatmul.msk.f32.vlgmr.msrb.gmra.mxu2 %vm218_vm2, %v269_v45 }
 0x2c3   :  { %v290_v47 = vpop.f32.mrf.mxu2 }
 0x2c4   :  { %v291_v48 = vadd.f32 %v290_v47, %v29_v46 }
 0x2c6   :  { %v294_v49 = vand.u32 2147483647, %v291_v48  ;;  %v293_v55 = vmax.f32 %v291_v48, 0.0 }
 0x2c8   :  { %v295_v50 = vsub.f32 0.0, %v294_v49 }
 0x2ca   :  { %v296_v51 = vmul.f32 1.442695, %v295_v50 }
 0x2cc   :  { %372 = vpow2.f32 %v296_v51 }
 0x2d2   :  { %v373_v52 = vpop.eup %372 }
 0x2d3   :  { %v298_v53 = vadd.f32 1.0, %v373_v52 }
 0x2d5   :  { %374 = vlog2.f32 %v298_v53 }
 0x2db   :  { %v375_v54 = vpop.eup %374 }
 0x2dc   :  { %v300_v56 = vmul.f32 0.6931472, %v375_v54 }
 0x2de   :  { %v301_v57 = vadd.f32 %v300_v56, %v293_v55 }
 0x2e0   :  { %303 = vst.msk [vmem:[%s521_s6] sm:$0x1] %vm302_vm3, %v301_v57 }

</bundles_post_ra>
